<compile_context>
chip_gen: v6e
topology: v6e:2x2x1
jax: 0.10.0
libtpu: 0.0.40
codegen_flags: <defaults>
</compile_context>

<pallas_src>
import jax
import jax.numpy as jnp
from jax.experimental import pallas as pl
from jax.experimental.pallas import tpu as pltpu


# Contract the last (lane) dim of both operands: (a, c) x (b, c) -> (a, b).
# With a (1, c) LHS this yields a lane-dense (1, b) row instead of a (b, 1) column.
_NT_DIMS = (((1,), (1,)), ((), ()))


def fm_kernel(b_ref, x_ref, va_ref, s_ref, o_ref):
    """One batch tile of the FM forward pass.

    b_ref:  SMEM (1,)        linear bias
    x_ref:  VMEM (tm, p)     input tile (the only streamed operand)
    va_ref: VMEM (p, k+1)    [v | w] augmented factor matrix (grid-constant)
    s_ref:  VMEM (1, p)      rowsum(v*v), precomputed in wrapper (grid-constant)
    o_ref:  VMEM (1, tm)     lane-dense output row for this tile
    """
    x = x_ref[...]

    # Single MXU pass over the x tile: z = x @ [v | w], f32 accumulation.
    # Folding the linear weight into v removes a second full (tm, p) pass.
    z = jnp.dot(x, va_ref[...], preferred_element_type=jnp.float32)        # (tm, k+1)

    # g_j = 0.5 * z_j^2 for the k factor columns, z_j for the linear (last) column,
    # so ones . g^T == 0.5*sum_k xv^2 + w.x as one lane-dense (1, tm) row.
    kdim = z.shape[1]
    col = jax.lax.broadcasted_iota(jnp.int32, (1, kdim), 1)
    is_factor = (col < kdim - 1).astype(jnp.float32)                        # (1, k+1)
    g = z * (0.5 * z * is_factor + (1.0 - is_factor))                       # (tm, k+1)
    ones = jnp.ones((1, kdim), jnp.float32)
    pos_row = jax.lax.dot_general(ones, g, _NT_DIMS,
                                  preferred_element_type=jnp.float32)       # (1, tm)

    # sum_k[(x^2) @ (v^2)] == (x^2) . rowsum(v^2): a single matvec, lane-dense.
    # x*x stays in the input dtype (matches the reference's input-precision square);
    # f32 accumulation protects the 0.5*(sum xv^2 - sum s.x^2) cancellation.
    xsq = x * x
    x2_row = jax.lax.dot_general(s_ref[...], xsq, _NT_DIMS,
                                 preferred_element_type=jnp.float32)        # (1, tm)

    o_ref[...] = (pos_row + b_ref[0] - 0.5 * x2_row).astype(o_ref.dtype)


def _pick_tm(N, p, itemsize):
    """Byte-based batch-tile sizing.

    Target a multi-MiB streamed x buffer (the kernel is HBM-bound at ~4 FLOP/byte)
    so per-grid-step overhead is amortized; only a 128-row alignment floor, no row cap.
    """
    target_bytes = 4 * 1024 * 1024                 # per x buffer (Pallas double-buffers it)
    tm = target_bytes // max(1, p * itemsize)
    tm = max(128, (tm // 128) * 128)
    # Megacore (v7x: 2 TCs/chip): keep >= 2 grid steps along the "parallel" batch axis
    # whenever N is large enough, so both cores / DMA queues stay busy.
    if N >= 2 * 128:
        half = ((N + 1) // 2 + 127) // 128 * 128
        tm = min(tm, half)
    return tm


def fm_forward(x, w, b, v, *, tm=None):
    """FM forward (eval semantics). x: (N, p), w: (p, 1), b: (1,), v: (p, k) -> (N, 1) f32."""
    N, p = x.shape
    k = v.shape[1]

    if tm is None:
        tm = _pick_tm(N, p, x.dtype.itemsize)
    if tm >= N:
        tm = N                                     # block == full array: no alignment needed
        num_tiles = 1
    else:
        num_tiles = pl.cdiv(N, tm)                 # tm is a multiple of 128 here
    n_pad = num_tiles * tm

    # Hoisted, grid-constant operands (computed once in XLA, VMEM-resident across grid):
    #   v_aug = [v | w]     -> one MXU pass yields xv and w.x together
    #   s_row = rowsum(v^2) -> (x^2)@(v^2) collapses to a single matvec
    v_aug = jnp.concatenate(
        [v.astype(jnp.float32), w.astype(jnp.float32).reshape(p, 1)], axis=1
    ).astype(x.dtype)
    s_row = jnp.sum(v.astype(jnp.float32) ** 2, axis=1).reshape(1, p).astype(x.dtype)
    b_vec = b.astype(jnp.float32).reshape(1)

    # NOTE: when N % tm != 0 the last x block reads past N (undefined rows). This is safe
    # because every output element depends only on its own row and the padded output
    # columns are sliced off below. Do NOT add cross-row reductions without padding x.
    out = pl.pallas_call(
        fm_kernel,
        out_shape=jax.ShapeDtypeStruct((1, n_pad), jnp.float32),
        grid_spec=pltpu.PrefetchScalarGridSpec(
            num_scalar_prefetch=0,
            grid=(num_tiles,),
            in_specs=[
                pl.BlockSpec(memory_space=pltpu.MemorySpace.SMEM),   # bias (1,)
                pl.BlockSpec((tm, p), lambda i: (i, 0)),             # x tile (streamed)
                pl.BlockSpec((p, k + 1), lambda i: (0, 0)),          # [v | w] (resident)
                pl.BlockSpec((1, p), lambda i: (0, 0)),              # rowsum(v^2) (resident)
            ],
            out_specs=pl.BlockSpec((1, tm), lambda i: (0, i)),       # lane-dense output slab
        ),
        compiler_params=pltpu.CompilerParams(
            dimension_semantics=("parallel",),
            # Above v5e's 16 MiB default scoped VMEM, safely under v7x's 64 MiB physical.
            vmem_limit_bytes=48 * 1024 * 1024,
        ),
    )(b_vec, x, v_aug, s_row)

    # Layout plumbing only: drop row padding and present as (N, 1).
    return out[0, :N].reshape(N, 1)


def fm_reference(x, w, b, v):
    linear_part = x @ w + b
    xv = x @ v
    inter_part = 0.5 * jnp.sum(xv**2 - (x**2) @ (v**2), axis=1, keepdims=True)
    return linear_part + inter_part


if __name__ == "__main__":
    # Small shapes consistent with FM(p, k): batch=8, p=16 features, k=8 factors.
    N, p, k = 8, 16, 8

    key = jax.random.PRNGKey(0)
    kx, kw, kb, kv = jax.random.split(key, 4)

    x = jax.random.normal(kx, (N, p), dtype=jnp.float32)

    # nn.Linear(p, 1) default init: U(-1/sqrt(p), 1/sqrt(p)) for weight and bias.
    bound = 1.0 / jnp.sqrt(jnp.float32(p))
    w = jax.random.uniform(kw, (p, 1), minval=-bound, maxval=bound, dtype=jnp.float32)
    b = jax.random.uniform(kb, (1,), minval=-bound, maxval=bound, dtype=jnp.float32)

    # xavier_normal_ for v: std = sqrt(2 / (p + k))
    v = jax.random.normal(kv, (p, k), dtype=jnp.float32) * jnp.sqrt(2.0 / (p + k))

    out = fm_forward(x, w, b, v)
    out = jax.block_until_ready(out)

    ref = fm_reference(x, w, b, v)
    assert out.shape == (N, 1)
    assert jnp.allclose(out, ref, atol=1e-4, rtol=1e-4), (out, ref)

    print("KERNEL_OK")
</pallas_src>

<mosaic_0001>
module attributes {stable_mosaic.version = 11 : i64} {
  func.func @fm_kernel(%arg0: i32, %arg1: memref<1xf32, #tpu.memory_space<smem>>, %arg2: memref<8x16xf32, #tpu.memory_space<vmem>>, %arg3: memref<16x9xf32, #tpu.memory_space<vmem>>, %arg4: memref<1x16xf32, #tpu.memory_space<vmem>>, %arg5: memref<1x8xf32, #tpu.memory_space<vmem>>) attributes {dimension_semantics = [#tpu.dimension_semantics<parallel>], iteration_bounds = array<i64: 1>, scalar_prefetch = 0 : i64, scratch_operands = 0 : i64, tpu.core_type = #tpu.core_type<tc>, window_params = [{transform_indices = @transform_0, window_bounds = array<i64: 1>}, {transform_indices = @transform_1, window_bounds = array<i64: 8, 16>}, {pipeline_mode = #tpu.pipeline_mode<synchronous>, transform_indices = @transform_2, window_bounds = array<i64: 16, 9>}, {pipeline_mode = #tpu.pipeline_mode<synchronous>, transform_indices = @transform_3, window_bounds = array<i64: 1, 16>}, {transform_indices = @transform_4, window_bounds = array<i64: 1, 8>}]} {
    %c0 = arith.constant 0 : index
    %c0_0 = arith.constant 0 : index
    %0 = vector.load %arg2[%c0, %c0_0] : memref<8x16xf32, #tpu.memory_space<vmem>>, vector<8x16xf32>
    %c0_1 = arith.constant 0 : index
    %c0_2 = arith.constant 0 : index
    %1 = vector.load %arg3[%c0_1, %c0_2] : memref<16x9xf32, #tpu.memory_space<vmem>>, vector<16x9xf32>
    %cst = arith.constant dense<0.000000e+00> : vector<8x9xf32>
    %2 = tpu.matmul %0, %1, %cst {dimension_numbers = #tpu.dot_dimension_numbers<[1], [0], [0], [1], [0, 0, 1, 1], [], []>} : vector<8x16xf32>, vector<16x9xf32>, vector<8x9xf32> -> vector<8x9xf32>
    %3 = tpu.iota {dimensions = array<i32: 1>} : vector<1x9xi32>
    %c8_i32 = arith.constant 8 : i32
    %4 = vector.broadcast %c8_i32 : i32 to vector<1x9xi32>
    %5 = arith.cmpi slt, %3, %4 : vector<1x9xi32>
    %6 = arith.extui %5 : vector<1x9xi1> to vector<1x9xi32>
    %7 = arith.sitofp %6 : vector<1x9xi32> to vector<1x9xf32>
    %cst_3 = arith.constant 5.000000e-01 : f32
    %8 = vector.broadcast %cst_3 : f32 to vector<8x9xf32>
    %9 = arith.mulf %8, %2 : vector<8x9xf32>
    %10 = vector.broadcast %7 : vector<1x9xf32> to vector<8x9xf32>
    %11 = arith.mulf %9, %10 : vector<8x9xf32>
    %cst_4 = arith.constant 1.000000e+00 : f32
    %12 = vector.broadcast %cst_4 : f32 to vector<1x9xf32>
    %13 = arith.subf %12, %7 : vector<1x9xf32>
    %14 = vector.broadcast %13 : vector<1x9xf32> to vector<8x9xf32>
    %15 = arith.addf %11, %14 : vector<8x9xf32>
    %16 = arith.mulf %2, %15 : vector<8x9xf32>
    %cst_5 = arith.constant 1.000000e+00 : f32
    %17 = vector.broadcast %cst_5 : f32 to vector<1x9xf32>
    %cst_6 = arith.constant dense<0.000000e+00> : vector<1x8xf32>
    %18 = tpu.matmul %17, %16, %cst_6 {dimension_numbers = #tpu.dot_dimension_numbers<[1], [1], [0], [0], [0, 0, 1, 0], [], []>} : vector<1x9xf32>, vector<8x9xf32>, vector<1x8xf32> -> vector<1x8xf32>
    %19 = arith.mulf %0, %0 : vector<8x16xf32>
    %c0_7 = arith.constant 0 : index
    %c0_8 = arith.constant 0 : index
    %20 = vector.load %arg4[%c0_7, %c0_8] : memref<1x16xf32, #tpu.memory_space<vmem>>, vector<1x16xf32>
    %cst_9 = arith.constant dense<0.000000e+00> : vector<1x8xf32>
    %21 = tpu.matmul %20, %19, %cst_9 {dimension_numbers = #tpu.dot_dimension_numbers<[1], [1], [0], [0], [0, 0, 1, 0], [], []>} : vector<1x16xf32>, vector<8x16xf32>, vector<1x8xf32> -> vector<1x8xf32>
    %c0_10 = arith.constant 0 : index
    %22 = memref.load %arg1[%c0_10] : memref<1xf32, #tpu.memory_space<smem>>
    %23 = vector.broadcast %22 : f32 to vector<1x8xf32>
    %24 = arith.addf %18, %23 : vector<1x8xf32>
    %cst_11 = arith.constant 5.000000e-01 : f32
    %25 = vector.broadcast %cst_11 : f32 to vector<1x8xf32>
    %26 = arith.mulf %25, %21 : vector<1x8xf32>
    %27 = arith.subf %24, %26 : vector<1x8xf32>
    %c0_12 = arith.constant 0 : index
    %c0_13 = arith.constant 0 : index
    %28 = vector.load %arg5[%c0_12, %c0_13] : memref<1x8xf32, #tpu.memory_space<vmem>>, vector<1x8xf32>
    tpu.vector_store %arg5[%c0_12, %c0_13], %27 {strides = array<i32>} : memref<1x8xf32, #tpu.memory_space<vmem>>, vector<1x8xf32>,
    return
  }
  func.func @transform_0(%arg0: i32) -> i32 {
    %c0_i32 = arith.constant 0 : i32
    %c0_i32_0 = arith.constant 0 : i32
    return %c0_i32 : i32
  }
  func.func @transform_1(%arg0: i32) -> (i32, i32) {
    %c0_i32 = arith.constant 0 : i32
    %c0_i32_0 = arith.constant 0 : i32
    return %arg0, %c0_i32 : i32, i32
  }
  func.func @transform_2(%arg0: i32) -> (i32, i32) {
    %c0_i32 = arith.constant 0 : i32
    %c0_i32_0 = arith.constant 0 : i32
    %c0_i32_1 = arith.constant 0 : i32
    return %c0_i32, %c0_i32_0 : i32, i32
  }
  func.func @transform_3(%arg0: i32) -> (i32, i32) {
    %c0_i32 = arith.constant 0 : i32
    %c0_i32_0 = arith.constant 0 : i32
    %c0_i32_1 = arith.constant 0 : i32
    return %c0_i32, %c0_i32_0 : i32, i32
  }
  func.func @transform_4(%arg0: i32) -> (i32, i32) {
    %c0_i32 = arith.constant 0 : i32
    %c0_i32_0 = arith.constant 0 : i32
    return %c0_i32, %arg0 : i32, i32
  }
}

</mosaic_0001>

<bundles_post_ra>
// kernel: tpu_custom_call.1
= control target key start
LH: loop header
LB: loop body
LE: loop exit
PB: predicated region body
PF: predicated region fallthrough
CT: control target
= control target key end

     0   :  { %10 = vsyncpa [#allocation4], 0  ;;  %s461_s0 = inlined_call_operand.<no memory space> [shape: f32[1], index: 0, kind: input, shape index: {}]   ;;  %s462_s1 = inlined_call_operand.hbm [shape: f32[8,16], index: 1, kind: input, shape index: {}]   ;;  %s463_s2 = inlined_call_operand.hbm [shape: f32[16,9], index: 2, kind: input, shape index: {}]   ;;  %s464_s3 = inlined_call_operand.vmem [shape: f32[1,16], index: 3, kind: input, shape index: {}]   ;;  %s465_s4 = inlined_call_operand.hbm [shape: f32[1,8], index: 4, kind: output, shape index: {}]  }
   0x1   :  { %11 = vsyncpa [#allocation7], 0 }
   0x2   :  { %12 = vsyncpa [#allocation5], 0  ;;  %s413_s15 = smov [#allocation3]   ;;  %s414_s17 = smov [#allocation6]  }
   0x3   :  { %s21_s16 = sshll.u32 %s413_s15, 4  ;;  %s30_s18 = sshll.u32 %s414_s17, 4  ;;  %s22_s16 = int_to_ptr.vmem [resolvable:$true] %s21_s16  ;;  %s31_s18 = int_to_ptr.vmem [resolvable:$true] %s30_s18 }
   0x4   :  { %s355_s19 = scalar_lea.vmem %s22_s16, 128  ;;  %p360_p1 = scmp.lt.s32.totalorder %s22_s16, %s22_s16 }
   0x5   :  { %p356_p0 = scmp.ne.s32.totalorder %s22_s16, %s355_s19  ;;  %p361_p2 = scmp.lt.s32.totalorder %s355_s19, %s355_s19 }
   0x7   :  { %p362_p3 = por %p361_p2, %p360_p1 }
   0x9   :  { %p363_p4 = pnand %p362_p3, %p356_p0 }
   0xb   :  { %366 = shalt.err (!%p363_p4)
}
   0xc   :  { %24 = dma.hbm_to_vmem [thread:$0]  %s462_s1, 128, %s22_s16, [#allocation4]  }
   0xd   :  { %s375_s22 = scalar_lea.vmem %s31_s18, 256  ;;  %p380_p6 = scmp.lt.s32.totalorder %s31_s18, %s31_s18 }
   0xe   :  { %p376_p5 = scmp.ne.s32.totalorder %s31_s18, %s375_s22  ;;  %p381_p7 = scmp.lt.s32.totalorder %s375_s22, %s375_s22 }
  0x10   :  { %p382_p8 = por %p381_p7, %p380_p6 }
  0x12   :  { %p383_p9 = pnand %p382_p8, %p376_p5 }
  0x14   :  { %386 = shalt.err (!%p383_p9)
}
  0x15   :  { %s415_s23 = smov 128   ;;  %s416_s24 = smov 8  }
  0x16   :  { %36 = dma.hbm_to_vmem [thread:$0]  %s463_s2, 256, %s31_s18, [#allocation7], %s415_s23, %s415_s23, %s416_s24  }
  0x17   :  { %407 = dma.done.wait [#allocation4], 128  }
  0x18   :  { %408 = vsyncadd [#allocation4], 4294967168 }
  0x19   :  { %409 = dma.done.wait [#allocation7], 256  }
  0x1a   :  { %410 = vsyncadd [#allocation7], 4294967040  ;;  %v417_v0 = vmov 0.0   ;;  %vm418_vm0 = vmmov 0   ;;  %v47_v1 = vld [vmem:[#allocation6 + $0x8] sm:$0xff]  ;;  %v46_v2 = vld [vmem:[#allocation6] sm:$0xff]  ;;  %v122_v6 = vlaneseq  ;;  %v211_v19 = vstv %s461_s0 }
  0x1b   :  { %322 = vmatprep.subr.mxu0 %v417_v0  ;;  %326 = vmatprep.mubr.msk.f32.mxu0 %vm418_vm0, %v417_v0  ;;  %v45_v3 = vld [vmem:[#allocation3] sm:$0xff]  ;;  %vm48_vm1 = vcmask 130048   ;;  %vm212_vm3 = vcmask 72704   ;;  %v419_v16 = vmov 1.0   ;;  %s420_s28 = smov [#allocation8]   ;;  %vm291_vm4 = vcmask 57344  }
  0x1c   :  { %329 = vmatprep.subr.mxu1 %v417_v0  ;;  %331 = vmatprep.mubr.msk.f32.mxu1 %vm418_vm0, %v417_v0  ;;  %v132_v4 = vmul.f32 %v45_v3, %v45_v3  ;;  %v133_v5 = vld [vmem:[%s464_s3] sm:$0x1]  ;;  %v123_v7 = vand.u32 127, %v122_v6  ;;  %s299_s29 = sshll.u32 %s420_s28, 4  ;;  %s300_s29 = int_to_ptr.vmem [resolvable:$true] %s299_s29 }
  0x1d   :  { %323 = vmatpush3.msra.mxu0 %v47_v1  ;;  %s387_s30 = scalar_lea.vmem %s300_s29, 16  ;;  %s391_s5 = scalar_lea.vmem %s300_s29, 32 }
  0x1e   :  { %324 = vmatprep.subr.mxu0 %v417_v0  ;;  %330 = vmatpush3.xpose.msk.msra.mxu1 %vm48_vm1, %v132_v4  ;;  %vm124_vm2 = vcmp.lt.s32.totalorder %v123_v7, 8  ;;  %p388_p10 = scmp.ne.s32.totalorder %s300_s29, %s387_s30  ;;  %p392_p11 = scmp.lt.s32.totalorder %s300_s29, %s300_s29 }
  0x1f   :  { %325 = vmatpush3.msra.mxu0 %v46_v2  ;;  %v310_v8 = vsel %vm124_vm2, 1.0, %v417_v0  ;;  %p393_p12 = scmp.lt.s32.totalorder %s391_s5, %s387_s30 }
  0x20   :  { %327 = vmatmul.mubr.msk.f32.vlgmr.msra.gmra.mxu0 %vm48_vm1, %v45_v3  ;;  %334 = vmatprep.subr.mxu0 %v417_v0  ;;  %v129_v11 = vsub.f32 1.0, %v310_v8 }
  0x21   :  { %336 = vmatprep.mubr.msk.f32.mxu0 %vm418_vm0, %v417_v0  ;;  %332 = vmatmul.mubr.msk.f32.vlgmr.msra.gmra.mxu1 %vm48_vm1, %v133_v5  ;;  %p394_p13 = por %p393_p12, %p392_p11 }
  0x23   :  { %p395_p0 = pnand %p394_p13, %p388_p10 }
  0xe0   :  { %v118_v9 = vpop.f32.mrf.mxu0 }
  0xe1   :  { %v127_v10 = vmul.f32 0.5, %v118_v9  ;;  %v206_v17 = vpop.f32.mrf.mxu1 }
  0xe2   :  { %v328_v12 = vpop.f32.mrf.mxu0  ;;  %v289_v20 = vmul.f32 0.5, %v206_v17 }
  0xe3   :  { %v128_v13 = vmul.f32 %v310_v8, %v127_v10  ;;  %v333_v18 = vpop.f32.mrf.mxu1 }
  0xe5   :  { %v130_v14 = vadd.f32 %v129_v11, %v128_v13 }
  0xe7   :  { %v131_v15 = vmul.f32 %v130_v14, %v118_v9 }
  0xe9   :  { %335 = vmatpush3.xpose.msk.msra.mxu0 %vm212_vm3, %v131_v15 }
  0xec   :  { %337 = vmatmul.mubr.msk.f32.vlgmr.msra.gmra.mxu0 %vm212_vm3, %v419_v16 }
 0x1ac   :  { %v285_v21 = vpop.f32.mrf.mxu0 }
 0x1ad   :  { %v286_v22 = vadd.f32 %v285_v21, %v211_v19 }
 0x1ae   :  { %v338_v23 = vpop.f32.mrf.mxu0 }
 0x1af   :  { %v290_v24 = vsub.f32 %v286_v22, %v289_v20 }
 0x1b1   :  { %292 = vst.msk [vmem:[#allocation8] sm:$0x1] %vm291_vm4, %v290_v24 }
 0x1b2   :  { %398 = shalt.err (!%p395_p0)
}
 0x1b3   :  { %302 = dma.vmem_to_hbm [thread:$0]  %s300_s29, 16, %s465_s4, [#allocation5]  }
 0x1b4   :  { %411 = dma.done.wait [#allocation5], 16  }
 0x1b5   :  { %412 = vsyncadd [#allocation5], 4294967280 }
 0x1b6   :  { %306 = vsyncpa [#allocation4], 1 }
 0x1b7   :  { %307 = vsyncpa [#allocation7], 1 }
 0x1b8   :  { %308 = vsyncpa [#allocation5], 1 }

</bundles_post_ra>
